<compile_context>
chip_gen: v7x
topology: tpu7x:2x2x1
jax: 0.10.0
libtpu: 0.0.40
codegen_flags: <defaults>
</compile_context>

<pallas_src>
import math

import jax
import jax.numpy as jnp
from jax.experimental import pallas as pl
from jax.experimental.pallas import tpu as pltpu


def _round_up(x, m):
    return ((x + m - 1) // m) * m


def _position_timing_kernel(x_ref, rel_ref, w1_ref, w2_ref, b_ref, o_ref):
    """One (token-tile, column-tile) block of the fused PositionTimingLayer.

    x_ref   : (tm, H)  input dtype  hidden-state tile (cast to bf16 in-kernel)
    rel_ref : (tm, 1)  f32          relative position per token
    w1_ref  : (H, tn)  bf16         fused position-path weight  (Wp^T @ Wi1^T)
    w2_ref  : (H, tn)  bf16         fused timing-path weight    (Wt^T @ Wi2^T)
    b_ref   : (1, tn)  f32          fused bias
    o_ref   : (tm, tn)              output tile
    """
    x = x_ref[...].astype(jnp.bfloat16)           # cast hides under the MXU
    pos = jnp.dot(x, w1_ref[...], preferred_element_type=jnp.float32)
    tim = jnp.dot(x, w2_ref[...], preferred_element_type=jnp.float32)
    # (rel * x) @ W2 == rel * (x @ W2) row-wise: scale the f32 accumulator.
    out = pos + rel_ref[...] * tim + b_ref[...]
    o_ref[...] = out.astype(o_ref.dtype)


def fuse_params(params, hidden_size):
    """One-time offline fusion of the two encoders with the integrator."""
    H = hidden_size
    hi = jax.lax.Precision.HIGHEST
    wi1_t = params["wi"][:, :H].T          # (H, H): pos features -> output
    wi2_t = params["wi"][:, H:].T          # (H, H): timing features -> output

    w1 = jnp.dot(params["wp"].T, wi1_t, precision=hi)          # (H, H)
    w2 = jnp.dot(params["wt"].T, wi2_t, precision=hi)          # (H, H)
    b = (jnp.dot(params["bp"], wi1_t, precision=hi)
         + jnp.dot(params["bt"], wi2_t, precision=hi)
         + params["bi"])                                        # (H,)
    return {
        "w1": w1.astype(jnp.bfloat16),
        "w2": w2.astype(jnp.bfloat16),
        "b": b.reshape(1, H).astype(jnp.float32),
        "H": H,
    }


def position_timing_forward(hidden_states, position_ids, fused, *,
                            tm=512, tn=None, out_dtype=None,
                            single_buffer_weights=True):
    """hidden_states: (B, S, H); position_ids: (B, S) int."""
    B, S, H = hidden_states.shape
    assert H == fused["H"]
    N = B * S
    out_dtype = hidden_states.dtype if out_dtype is None else jnp.dtype(out_dtype)

    # Activations: reshape only (free). No cast / pad / slice HBM passes.
    x = hidden_states.reshape(N, H)

    # relative_positions = position_ids / position_ids.max()
    # (guarded against the degenerate all-zero case that would NaN in PyTorch).
    pmax = jnp.maximum(position_ids.max().astype(jnp.float32), 1.0)
    rel = (position_ids.astype(jnp.float32) / pmax).reshape(N, 1)

    # ---- generation-aware VMEM budget -----------------------------------
    try:
        vmem_phys = int(pltpu.get_tpu_info().vmem_capacity_bytes)
    except Exception:
        vmem_phys = 64 << 20              # conservative (v7x per-TC) fallback
    vmem_cap = int(vmem_phys * 0.85)      # headroom for Mosaic internal scratch

    # ---- tiling -----------------------------------------------------------
    tm_eff = max(8, min(tm, _round_up(N, 8)))          # token tile (sublane-mult)

    w_resident_bytes = 2 * H * H * 2                   # two bf16 (H, H) weights
    if tn is None:
        if H % 128 == 0 and w_resident_bytes > int(0.4 * vmem_cap):
            tn_eff = 512                               # column-tile the weights
        else:
            tn_eff = H                                 # fully resident weights
    else:
        tn_eff = tn

    grid_rows = pl.cdiv(N, tm_eff)
    grid_cols = pl.cdiv(H, tn_eff)
    weights_resident = grid_cols == 1
    use_single_buffer = single_buffer_weights and weights_resident

    xr_idx = lambda i, j: (i, 0)          # token streams; constant across columns
    w_idx = lambda i, j: (0, j)           # weights stream only along columns
    if use_single_buffer:
        w_spec = pl.BlockSpec((H, tn_eff), w_idx, pipeline_mode=pl.Buffered(1))
        b_spec = pl.BlockSpec((1, tn_eff), w_idx, pipeline_mode=pl.Buffered(1))
    else:
        w_spec = pl.BlockSpec((H, tn_eff), w_idx)
        b_spec = pl.BlockSpec((1, tn_eff), w_idx)

    in_specs = [pl.BlockSpec((tm_eff, H), xr_idx),     # x
                pl.BlockSpec((tm_eff, 1), xr_idx),     # rel
                w_spec, w_spec, b_spec]
    out_spec = pl.BlockSpec((tm_eff, tn_eff), lambda i, j: (i, j))

    # ---- VMEM limit & cost estimate ---------------------------------------
    x_isz = jnp.dtype(hidden_states.dtype).itemsize
    o_isz = jnp.dtype(out_dtype).itemsize
    w_buf = 1 if use_single_buffer else 2
    vmem_needed = (w_buf * (2 * H * tn_eff * 2 + tn_eff * 4)
                   + 2 * (tm_eff * H * x_isz + tm_eff * 4 + tm_eff * tn_eff * o_isz)
                   + (4 << 20))
    vmem_limit = int(min(max(vmem_needed, 16 << 20), vmem_cap))

    cost = pl.CostEstimate(
        flops=4 * N * H * H,                 # two (N,H)x(H,H) matmuls
        transcendentals=0,
        bytes_accessed=(N * H * x_isz + N * 4        # x, rel
                        + 2 * H * H * 2 + H * 4      # weights, bias
                        + N * H * o_isz))            # output

    out = pl.pallas_call(
        _position_timing_kernel,
        out_shape=jax.ShapeDtypeStruct((N, H), out_dtype),
        grid_spec=pltpu.PrefetchScalarGridSpec(
            num_scalar_prefetch=0,
            grid=(grid_rows, grid_cols),
            in_specs=in_specs,
            out_specs=out_spec,
        ),
        compiler_params=pltpu.CompilerParams(
            dimension_semantics=("parallel", "parallel"),
            vmem_limit_bytes=vmem_limit,
        ),
        cost_estimate=cost,
    )(x, rel, fused["w1"], fused["w2"], fused["b"])

    return out.reshape(B, S, H)


def init_params(key, hidden_size):
    """Deterministic init mimicking nn.Linear default (uniform +-1/sqrt(fan_in))."""
    H = hidden_size
    ks = jax.random.split(key, 6)
    bnd_h = 1.0 / math.sqrt(H)
    bnd_2h = 1.0 / math.sqrt(2 * H)
    return {
        # PyTorch nn.Linear stores weight as (out_features, in_features)
        "wp": jax.random.uniform(ks[0], (H, H), jnp.float32, -bnd_h, bnd_h),
        "bp": jax.random.uniform(ks[1], (H,), jnp.float32, -bnd_h, bnd_h),
        "wt": jax.random.uniform(ks[2], (H, H), jnp.float32, -bnd_h, bnd_h),
        "bt": jax.random.uniform(ks[3], (H,), jnp.float32, -bnd_h, bnd_h),
        "wi": jax.random.uniform(ks[4], (H, 2 * H), jnp.float32, -bnd_2h, bnd_2h),
        "bi": jax.random.uniform(ks[5], (H,), jnp.float32, -bnd_2h, bnd_2h),
    }


def reference_forward(hidden_states, position_ids, params):
    """Pure-JAX f32 reference mirroring the PyTorch forward."""
    hi = jax.lax.Precision.HIGHEST
    pos = jnp.dot(hidden_states, params["wp"].T, precision=hi) + params["bp"]
    rel = position_ids.astype(jnp.float32) / position_ids.max().astype(jnp.float32)
    rel = jnp.broadcast_to(rel[..., None], hidden_states.shape)
    tim = jnp.dot(hidden_states * rel, params["wt"].T, precision=hi) + params["bt"]
    combined = jnp.concatenate([pos, tim], axis=-1)
    return jnp.dot(combined, params["wi"].T, precision=hi) + params["bi"]


if __name__ == "__main__":
    key = jax.random.PRNGKey(0)
    k_x, k_p = jax.random.split(key)

    B, S, H = 2, 8, 32
    hidden_states = jax.random.normal(k_x, (B, S, H), jnp.float32)
    position_ids = jnp.broadcast_to(jnp.arange(S, dtype=jnp.int32), (B, S))

    params = init_params(k_p, H)
    fused = fuse_params(params, H)

    try:
        out = position_timing_forward(hidden_states, position_ids, fused)
    except Exception:
        # Fallback if single-buffered (pl.Buffered(1)) weight blocks are not
        # supported by this JAX version: use default double-buffering.
        out = position_timing_forward(hidden_states, position_ids, fused,
                                      single_buffer_weights=False)
    out = jax.block_until_ready(out)

    ref = reference_forward(hidden_states, position_ids, params)
    assert out.shape == (B, S, H)
    # bf16 matmul operands (f32 accumulation) -> loosened tolerance vs f32 reference.
    assert jnp.allclose(out, ref, atol=2e-2, rtol=2e-2), "mismatch vs reference"

    print("KERNEL_OK")
</pallas_src>

<mosaic_0001>
module attributes {stable_mosaic.version = 11 : i64} {
  func.func @_position_timing_kernel(%arg0: i32, %arg1: i32, %arg2: memref<16x32xf32, #tpu.memory_space<vmem>>, %arg3: memref<16x1xf32, #tpu.memory_space<vmem>>, %arg4: memref<32x32xbf16, #tpu.memory_space<vmem>>, %arg5: memref<32x32xbf16, #tpu.memory_space<vmem>>, %arg6: memref<1x32xf32, #tpu.memory_space<vmem>>, %arg7: memref<16x32xf32, #tpu.memory_space<vmem>>) attributes {dimension_semantics = [#tpu.dimension_semantics<parallel>, #tpu.dimension_semantics<parallel>], iteration_bounds = array<i64: 1, 1>, scalar_prefetch = 0 : i64, scratch_operands = 0 : i64, tpu.core_type = #tpu.core_type<tc>, window_params = [{transform_indices = @transform_0, window_bounds = array<i64: 16, 32>}, {transform_indices = @transform_1, window_bounds = array<i64: 16, 1>}, {pipeline_mode = #tpu.pipeline_mode<synchronous>, transform_indices = @transform_2, window_bounds = array<i64: 32, 32>}, {pipeline_mode = #tpu.pipeline_mode<synchronous>, transform_indices = @transform_3, window_bounds = array<i64: 32, 32>}, {pipeline_mode = #tpu.pipeline_mode<synchronous>, transform_indices = @transform_4, window_bounds = array<i64: 1, 32>}, {transform_indices = @transform_5, window_bounds = array<i64: 16, 32>}]} {
    %c0 = arith.constant 0 : index
    %c0_0 = arith.constant 0 : index
    %0 = vector.load %arg2[%c0, %c0_0] : memref<16x32xf32, #tpu.memory_space<vmem>>, vector<16x32xf32>
    %1 = arith.truncf %0 : vector<16x32xf32> to vector<16x32xbf16>
    %c0_1 = arith.constant 0 : index
    %c0_2 = arith.constant 0 : index
    %2 = vector.load %arg4[%c0_1, %c0_2] : memref<32x32xbf16, #tpu.memory_space<vmem>>, vector<32x32xbf16>
    %cst = arith.constant dense<0.000000e+00> : vector<16x32xf32>
    %3 = tpu.matmul %1, %2, %cst {dimension_numbers = #tpu.dot_dimension_numbers<[1], [0], [0], [1], [0, 0, 1, 1], [], []>} : vector<16x32xbf16>, vector<32x32xbf16>, vector<16x32xf32> -> vector<16x32xf32>
    %c0_3 = arith.constant 0 : index
    %c0_4 = arith.constant 0 : index
    %4 = vector.load %arg5[%c0_3, %c0_4] : memref<32x32xbf16, #tpu.memory_space<vmem>>, vector<32x32xbf16>
    %cst_5 = arith.constant dense<0.000000e+00> : vector<16x32xf32>
    %5 = tpu.matmul %1, %4, %cst_5 {dimension_numbers = #tpu.dot_dimension_numbers<[1], [0], [0], [1], [0, 0, 1, 1], [], []>} : vector<16x32xbf16>, vector<32x32xbf16>, vector<16x32xf32> -> vector<16x32xf32>
    %c0_6 = arith.constant 0 : index
    %c0_7 = arith.constant 0 : index
    %6 = vector.load %arg3[%c0_6, %c0_7] : memref<16x1xf32, #tpu.memory_space<vmem>>, vector<16x1xf32>
    %7 = vector.broadcast %6 : vector<16x1xf32> to vector<16x32xf32>
    %8 = arith.mulf %7, %5 : vector<16x32xf32>
    %9 = arith.addf %3, %8 : vector<16x32xf32>
    %c0_8 = arith.constant 0 : index
    %c0_9 = arith.constant 0 : index
    %10 = vector.load %arg6[%c0_8, %c0_9] : memref<1x32xf32, #tpu.memory_space<vmem>>, vector<1x32xf32>
    %11 = vector.broadcast %10 : vector<1x32xf32> to vector<16x32xf32>
    %12 = arith.addf %9, %11 : vector<16x32xf32>
    %c0_10 = arith.constant 0 : index
    %c0_11 = arith.constant 0 : index
    %13 = vector.load %arg7[%c0_10, %c0_11] : memref<16x32xf32, #tpu.memory_space<vmem>>, vector<16x32xf32>
    tpu.vector_store %arg7[%c0_10, %c0_11], %12 {strides = array<i32>} : memref<16x32xf32, #tpu.memory_space<vmem>>, vector<16x32xf32>,
    return
  }
  func.func @transform_0(%arg0: i32, %arg1: i32) -> (i32, i32) {
    %c0_i32 = arith.constant 0 : i32
    %c0_i32_0 = arith.constant 0 : i32
    return %arg0, %c0_i32 : i32, i32
  }
  func.func @transform_1(%arg0: i32, %arg1: i32) -> (i32, i32) {
    %c0_i32 = arith.constant 0 : i32
    %c0_i32_0 = arith.constant 0 : i32
    return %arg0, %c0_i32 : i32, i32
  }
  func.func @transform_2(%arg0: i32, %arg1: i32) -> (i32, i32) {
    %c0_i32 = arith.constant 0 : i32
    %c0_i32_0 = arith.constant 0 : i32
    return %c0_i32, %arg1 : i32, i32
  }
  func.func @transform_3(%arg0: i32, %arg1: i32) -> (i32, i32) {
    %c0_i32 = arith.constant 0 : i32
    %c0_i32_0 = arith.constant 0 : i32
    return %c0_i32, %arg1 : i32, i32
  }
  func.func @transform_4(%arg0: i32, %arg1: i32) -> (i32, i32) {
    %c0_i32 = arith.constant 0 : i32
    %c0_i32_0 = arith.constant 0 : i32
    return %c0_i32, %arg1 : i32, i32
  }
  func.func @transform_5(%arg0: i32, %arg1: i32) -> (i32, i32) {
    %c0_i32 = arith.constant 0 : i32
    return %arg0, %arg1 : i32, i32
  }
}

module attributes {stable_mosaic.version = 11 : i64} {
  func.func @_position_timing_kernel(%arg0: i32, %arg1: i32, %arg2: memref<16x32xf32, #tpu.memory_space<vmem>>, %arg3: memref<16x1xf32, #tpu.memory_space<vmem>>, %arg4: memref<32x32xbf16, #tpu.memory_space<vmem>>, %arg5: memref<32x32xbf16, #tpu.memory_space<vmem>>, %arg6: memref<1x32xf32, #tpu.memory_space<vmem>>, %arg7: memref<16x32xf32, #tpu.memory_space<vmem>>) attributes {dimension_semantics = [#tpu.dimension_semantics<parallel>, #tpu.dimension_semantics<parallel>], iteration_bounds = array<i64: 1, 1>, scalar_prefetch = 0 : i64, scratch_operands = 0 : i64, tpu.core_type = #tpu.core_type<tc>, window_params = [{transform_indices = @transform_0, window_bounds = array<i64: 16, 32>}, {transform_indices = @transform_1, window_bounds = array<i64: 16, 1>}, {transform_indices = @transform_2, window_bounds = array<i64: 32, 32>}, {transform_indices = @transform_3, window_bounds = array<i64: 32, 32>}, {transform_indices = @transform_4, window_bounds = array<i64: 1, 32>}, {transform_indices = @transform_5, window_bounds = array<i64: 16, 32>}]} {
    %c0 = arith.constant 0 : index
    %c0_0 = arith.constant 0 : index
    %0 = vector.load %arg2[%c0, %c0_0] : memref<16x32xf32, #tpu.memory_space<vmem>>, vector<16x32xf32>
    %1 = arith.truncf %0 : vector<16x32xf32> to vector<16x32xbf16>
    %c0_1 = arith.constant 0 : index
    %c0_2 = arith.constant 0 : index
    %2 = vector.load %arg4[%c0_1, %c0_2] : memref<32x32xbf16, #tpu.memory_space<vmem>>, vector<32x32xbf16>
    %cst = arith.constant dense<0.000000e+00> : vector<16x32xf32>
    %3 = tpu.matmul %1, %2, %cst {dimension_numbers = #tpu.dot_dimension_numbers<[1], [0], [0], [1], [0, 0, 1, 1], [], []>} : vector<16x32xbf16>, vector<32x32xbf16>, vector<16x32xf32> -> vector<16x32xf32>
    %c0_3 = arith.constant 0 : index
    %c0_4 = arith.constant 0 : index
    %4 = vector.load %arg5[%c0_3, %c0_4] : memref<32x32xbf16, #tpu.memory_space<vmem>>, vector<32x32xbf16>
    %cst_5 = arith.constant dense<0.000000e+00> : vector<16x32xf32>
    %5 = tpu.matmul %1, %4, %cst_5 {dimension_numbers = #tpu.dot_dimension_numbers<[1], [0], [0], [1], [0, 0, 1, 1], [], []>} : vector<16x32xbf16>, vector<32x32xbf16>, vector<16x32xf32> -> vector<16x32xf32>
    %c0_6 = arith.constant 0 : index
    %c0_7 = arith.constant 0 : index
    %6 = vector.load %arg3[%c0_6, %c0_7] : memref<16x1xf32, #tpu.memory_space<vmem>>, vector<16x1xf32>
    %7 = vector.broadcast %6 : vector<16x1xf32> to vector<16x32xf32>
    %8 = arith.mulf %7, %5 : vector<16x32xf32>
    %9 = arith.addf %3, %8 : vector<16x32xf32>
    %c0_8 = arith.constant 0 : index
    %c0_9 = arith.constant 0 : index
    %10 = vector.load %arg6[%c0_8, %c0_9] : memref<1x32xf32, #tpu.memory_space<vmem>>, vector<1x32xf32>
    %11 = vector.broadcast %10 : vector<1x32xf32> to vector<16x32xf32>
    %12 = arith.addf %9, %11 : vector<16x32xf32>
    %c0_10 = arith.constant 0 : index
    %c0_11 = arith.constant 0 : index
    %13 = vector.load %arg7[%c0_10, %c0_11] : memref<16x32xf32, #tpu.memory_space<vmem>>, vector<16x32xf32>
    tpu.vector_store %arg7[%c0_10, %c0_11], %12 {strides = array<i32>} : memref<16x32xf32, #tpu.memory_space<vmem>>, vector<16x32xf32>,
    return
  }
  func.func @transform_0(%arg0: i32, %arg1: i32) -> (i32, i32) {
    %c0_i32 = arith.constant 0 : i32
    %c0_i32_0 = arith.constant 0 : i32
    return %arg0, %c0_i32 : i32, i32
  }
  func.func @transform_1(%arg0: i32, %arg1: i32) -> (i32, i32) {
    %c0_i32 = arith.constant 0 : i32
    %c0_i32_0 = arith.constant 0 : i32
    return %arg0, %c0_i32 : i32, i32
  }
  func.func @transform_2(%arg0: i32, %arg1: i32) -> (i32, i32) {
    %c0_i32 = arith.constant 0 : i32
    %c0_i32_0 = arith.constant 0 : i32
    return %c0_i32, %arg1 : i32, i32
  }
  func.func @transform_3(%arg0: i32, %arg1: i32) -> (i32, i32) {
    %c0_i32 = arith.constant 0 : i32
    %c0_i32_0 = arith.constant 0 : i32
    return %c0_i32, %arg1 : i32, i32
  }
  func.func @transform_4(%arg0: i32, %arg1: i32) -> (i32, i32) {
    %c0_i32 = arith.constant 0 : i32
    %c0_i32_0 = arith.constant 0 : i32
    return %c0_i32, %arg1 : i32, i32
  }
  func.func @transform_5(%arg0: i32, %arg1: i32) -> (i32, i32) {
    %c0_i32 = arith.constant 0 : i32
    return %arg0, %arg1 : i32, i32
  }
}

</mosaic_0001>

<bundles_post_ra>
// kernel: tpu_custom_call.1
= control target key start
LH: loop header
LB: loop body
LE: loop exit
PB: predicated region body
PF: predicated region fallthrough
CT: control target
= control target key end

     0   :  { %10 = vsyncpa [#allocation3], 0  ;;  %s425_s0 = inlined_call_operand.vmem [shape: f32[16,32], index: 0, kind: input, shape index: {}]   ;;  %s426_s1 = inlined_call_operand.vmem [shape: f32[16,1], index: 1, kind: input, shape index: {}]   ;;  %s427_s2 = inlined_call_operand.hbm [shape: bf16[32,32], index: 2, kind: input, shape index: {}]   ;;  %s428_s3 = inlined_call_operand.hbm [shape: bf16[32,32], index: 3, kind: input, shape index: {}]   ;;  %s429_s4 = inlined_call_operand.vmem [shape: f32[1,32], index: 4, kind: input, shape index: {}]   ;;  %s430_s5 = inlined_call_operand.hbm [shape: f32[16,32], index: 5, kind: output, shape index: {}]  }
   0x1   :  { %11 = vsyncpa [#allocation6], 0 }
   0x2   :  { %12 = vsyncpa [#allocation4], 0  ;;  %s330_s18 = smov [#allocation2]   ;;  %s258_s22 = scalar_lea.hbm %s427_s2, 256 }
   0x3   :  { %s22_s19 = sshll.u32 %s330_s18, 4  ;;  %p259_p0 = scmp.ne.s32.totalorder %s427_s2, %s258_s22  ;;  %s23_s19 = int_to_ptr.vmem [resolvable:$true] %s22_s19 }
   0x4   :  { %p262_p1 = scmp.lt.u32.totalorder %s258_s22, %s427_s2 }
   0x6   :  { %p264_p2 = pnand %p262_p1, %p259_p0 }
   0x8   :  { %267 = shalt.err (!%p264_p2)
}
   0x9   :  { %s268_s27 = scalar_lea.vmem %s23_s19, 256  ;;  %p273_p4 = scmp.lt.s32.totalorder %s23_s19, %s23_s19 }
   0xa   :  { %p269_p3 = scmp.ne.s32.totalorder %s23_s19, %s268_s27  ;;  %p274_p5 = scmp.lt.s32.totalorder %s268_s27, %s268_s27 }
   0xc   :  { %p275_p6 = por %p274_p5, %p273_p4 }
   0xe   :  { %p276_p7 = pnand %p275_p6, %p269_p3 }
  0x10   :  { %279 = shalt.err (!%p276_p7)
}
  0x11   :  { %s331_s28 = smov 64   ;;  %s332_s29 = smov 4  }
  0x12   :  { %28 = dma.hbm_to_vmem [thread:$0]  %s427_s2, 256, %s23_s19, [#allocation3], %s331_s28, %s331_s28, %s332_s29  }
  0x13   :  { %s333_s7 = smov [#allocation5]   ;;  %s280_s11 = scalar_lea.hbm %s428_s3, 256 }
  0x14   :  { %s34_s8 = sshll.u32 %s333_s7, 4  ;;  %p281_p8 = scmp.ne.s32.totalorder %s428_s3, %s280_s11  ;;  %s35_s8 = int_to_ptr.vmem [resolvable:$true] %s34_s8 }
  0x15   :  { %p284_p9 = scmp.lt.u32.totalorder %s280_s11, %s428_s3 }
  0x17   :  { %p286_p10 = pnand %p284_p9, %p281_p8 }
  0x19   :  { %289 = shalt.err (!%p286_p10)
}
  0x1a   :  { %s290_s16 = scalar_lea.vmem %s35_s8, 256  ;;  %p295_p12 = scmp.lt.s32.totalorder %s35_s8, %s35_s8 }
  0x1b   :  { %p291_p11 = scmp.ne.s32.totalorder %s35_s8, %s290_s16  ;;  %p296_p13 = scmp.lt.s32.totalorder %s290_s16, %s290_s16 }
  0x1d   :  { %p297_p0 = por %p296_p13, %p295_p12 }
  0x1f   :  { %p298_p1 = pnand %p297_p0, %p291_p11 }
  0x21   :  { %301 = shalt.err (!%p298_p1)
}
  0x22   :  { %40 = dma.hbm_to_vmem [thread:$0]  %s428_s3, 256, %s35_s8, [#allocation6], %s331_s28, %s331_s28, %s332_s29  }
  0x23   :  { %324 = dma.done.wait [#allocation3], 256  }
  0x24   :  { %325 = vsyncadd [#allocation3], 4294967040 }
  0x25   :  { %326 = dma.done.wait [#allocation6], 256  }
  0x26   :  { %327 = vsyncadd [#allocation6], 4294967040  ;;  %v334_v0 = vmov 0.0   ;;  %vm335_vm0 = vmmov 0   ;;  %v336_v1 = vmov 0   ;;  %v254_v2 = vld [vmem:[#allocation5] sm:$0xff]  }
  0x27   :  { %227 = vmatprep.subr.bf16.mxu0 %v334_v0  ;;  %235 = vmatprep.subr.bf16.mxu1 %v334_v0  ;;  %v255_v3 = vld [vmem:[#allocation2] sm:$0xff]   ;;  %v256_v4 = vld [vmem:[#allocation5 + $0x8] sm:$0xff]   ;;  %v257_v5 = vld [vmem:[#allocation2 + $0x8] sm:$0xff]   ;;  %vm73_vm1 = vcmask 261120  }
  0x28   :  { %231 = vmatprep.mubr.msk.bf16.mxu0 %vm335_vm0, %v334_v0  ;;  %239 = vmatprep.mubr.msk.bf16.mxu1 %vm335_vm0, %v334_v0  ;;  %v50_v6 = vld [vmem:[%s425_s0] sm:$0xff]  ;;  %v51_v7 = vld [vmem:[%s425_s0 + $0x8] sm:$0xff] }
  0x29   :  { %253 = vset.pattern.permute.xlu0 %v336_v1  ;;  %228 = vmatpush3.bf16.msra.mxu0 %v254_v2  ;;  %v118_v8 = vld [vmem:[%s426_s1] sm:$0xff]  ;;  %v52_v9 = vpack.c.bf16 %v51_v7, %v50_v6  ;;  %v119_v10 = vld [vmem:[%s426_s1 + $0x8] sm:$0xff]  ;;  %s337_s1 = smov [#allocation7]  }
  0x2a   :  { %236 = vmatpush3.bf16.msra.mxu1 %v255_v3  ;;  %229 = vmatprep.subr.bf16.mxu0 %v334_v0  ;;  %v220_v17 = vld [vmem:[%s429_s4] ss:$0 sm:$0xff]  ;;  %s201_s26 = sshll.u32 %s337_s1, 4  ;;  %s202_s26 = int_to_ptr.vmem [resolvable:$true] %s201_s26 }
  0x2b   :  { %237 = vmatprep.subr.bf16.mxu1 %v334_v0  ;;  %122 = vperm.xlu0 %253, %v118_v8   ;;  %s302_s27 = scalar_lea.vmem %s202_s26, 256  ;;  %p307_p3 = scmp.lt.s32.totalorder %s202_s26, %s202_s26 }
  0x2c   :  { %p303_p2 = scmp.ne.s32.totalorder %s202_s26, %s302_s27  ;;  %p308_p4 = scmp.lt.s32.totalorder %s302_s27, %s302_s27 }
  0x2d   :  { %230 = vmatpush3.bf16.msra.mxu0 %v256_v4 }
  0x2e   :  { %238 = vmatpush3.bf16.msra.mxu1 %v257_v5  ;;  %p309_p5 = por %p308_p4, %p307_p3 }
  0x2f   :  { %127 = vperm.xlu0 %253, %v119_v10  }
  0x30   :  { %232 = vmatmul.mubr.msk.bf16.vlgmr.msra.gmra.mrb[0].mxu0 %vm73_vm1, %v52_v9  ;;  %p310_p6 = pnand %p309_p5, %p303_p2 }
  0x31   :  { %240 = vmatmul.mubr.msk.bf16.vlgmr.msra.gmra.mrb[0].mxu1 %vm73_vm1, %v52_v9 }
  0xaa   :  { %v123_v11 = vpop.permute.xlu0 %122 }
  0xae   :  { %v128_v12 = vpop.permute.xlu0 %127 }
 0x103   :  { %v111_v13 = vpop.f32.mrb[0].mxu0 }
 0x104   :  { %v130_v14 = vmul.f32 %v123_v11, %v111_v13  ;;  %v178_v15 = vpop.f32.mrb[0].mxu1  ;;  %v233_v16 = vpop.f32.mrb[1].mxu0 }
 0x105   :  { %v241_v18 = vpop.f32.mrb[1].mxu1  ;;  %v114_v19 = vpop.f32.mrb[2].mxu0 }
 0x106   :  { %v179_v20 = vadd.f32 %v178_v15, %v130_v14  ;;  %v131_v21 = vmul.f32 %v128_v12, %v114_v19  ;;  %v181_v22 = vpop.f32.mrb[2].mxu1  ;;  %v234_v23 = vpop.f32.mrb[3].mxu0 }
 0x107   :  { %v242_v24 = vpop.f32.mrb[3].mxu1 }
 0x108   :  { %v192_v25 = vadd.f32 %v220_v17, %v179_v20  ;;  %v182_v26 = vadd.f32 %v181_v22, %v131_v21 }
 0x10a   :  { %194 = vst.msk [vmem:[#allocation7] sm:$0xff] %vm73_vm1, %v192_v25  ;;  %v193_v27 = vadd.f32 %v220_v17, %v182_v26 }
 0x10c   :  { %195 = vst.msk [vmem:[#allocation7 + $0x8] sm:$0xff] %vm73_vm1, %v193_v27 }
 0x10d   :  { %313 = shalt.err (!%p310_p6)
}
 0x10e   :  { %s314_s29 = scalar_lea.hbm %s430_s5, 256 }
 0x10f   :  { %p315_p7 = scmp.ne.s32.totalorder %s430_s5, %s314_s29  ;;  %p318_p8 = scmp.lt.u32.totalorder %s314_s29, %s430_s5 }
 0x111   :  { %p320_p9 = pnand %p318_p8, %p315_p7 }
 0x113   :  { %323 = shalt.err (!%p320_p9)
}
 0x114   :  { %s338_s9 = smov 128   ;;  %s339_s10 = smov 8  }
 0x115   :  { %207 = dma.vmem_to_hbm [thread:$0]  %s202_s26, 256, %s430_s5, [#allocation4], %s338_s9, %s338_s9, %s339_s10  }
 0x116   :  { %328 = dma.done.wait [#allocation4], 256  }
 0x117   :  { %329 = vsyncadd [#allocation4], 4294967040 }
 0x118   :  { %211 = vsyncpa [#allocation3], 1 }
 0x119   :  { %212 = vsyncpa [#allocation6], 1 }
 0x11a   :  { %213 = vsyncpa [#allocation4], 1 }

// kernel: tpu_custom_call.1
= control target key start
LH: loop header
LB: loop body
LE: loop exit
PB: predicated region body
PF: predicated region fallthrough
CT: control target
= control target key end

     0   :  { %10 = vsyncpa [#allocation3], 0  ;;  %s425_s0 = inlined_call_operand.vmem [shape: f32[16,32], index: 0, kind: input, shape index: {}]   ;;  %s426_s1 = inlined_call_operand.vmem [shape: f32[16,1], index: 1, kind: input, shape index: {}]   ;;  %s427_s2 = inlined_call_operand.hbm [shape: bf16[32,32], index: 2, kind: input, shape index: {}]   ;;  %s428_s3 = inlined_call_operand.hbm [shape: bf16[32,32], index: 3, kind: input, shape index: {}]   ;;  %s429_s4 = inlined_call_operand.vmem [shape: f32[1,32], index: 4, kind: input, shape index: {}]   ;;  %s430_s5 = inlined_call_operand.hbm [shape: f32[16,32], index: 5, kind: output, shape index: {}]  }
   0x1   :  { %11 = vsyncpa [#allocation6], 0 }
   0x2   :  { %12 = vsyncpa [#allocation4], 0  ;;  %s330_s18 = smov [#allocation2]   ;;  %s258_s22 = scalar_lea.hbm %s427_s2, 256 }
   0x3   :  { %s22_s19 = sshll.u32 %s330_s18, 4  ;;  %p259_p0 = scmp.ne.s32.totalorder %s427_s2, %s258_s22  ;;  %s23_s19 = int_to_ptr.vmem [resolvable:$true] %s22_s19 }
   0x4   :  { %p262_p1 = scmp.lt.u32.totalorder %s258_s22, %s427_s2 }
   0x6   :  { %p264_p2 = pnand %p262_p1, %p259_p0 }
   0x8   :  { %267 = shalt.err (!%p264_p2)
}
   0x9   :  { %s268_s27 = scalar_lea.vmem %s23_s19, 256  ;;  %p273_p4 = scmp.lt.s32.totalorder %s23_s19, %s23_s19 }
   0xa   :  { %p269_p3 = scmp.ne.s32.totalorder %s23_s19, %s268_s27  ;;  %p274_p5 = scmp.lt.s32.totalorder %s268_s27, %s268_s27 }
   0xc   :  { %p275_p6 = por %p274_p5, %p273_p4 }
   0xe   :  { %p276_p7 = pnand %p275_p6, %p269_p3 }
  0x10   :  { %279 = shalt.err (!%p276_p7)
}
  0x11   :  { %s331_s28 = smov 64   ;;  %s332_s29 = smov 4  }
  0x12   :  { %28 = dma.hbm_to_vmem [thread:$0]  %s427_s2, 256, %s23_s19, [#allocation3], %s331_s28, %s331_s28, %s332_s29  }
  0x13   :  { %s333_s7 = smov [#allocation5]   ;;  %s280_s11 = scalar_lea.hbm %s428_s3, 256 }
  0x14   :  { %s34_s8 = sshll.u32 %s333_s7, 4  ;;  %p281_p8 = scmp.ne.s32.totalorder %s428_s3, %s280_s11  ;;  %s35_s8 = int_to_ptr.vmem [resolvable:$true] %s34_s8 }
  0x15   :  { %p284_p9 = scmp.lt.u32.totalorder %s280_s11, %s428_s3 }
  0x17   :  { %p286_p10 = pnand %p284_p9, %p281_p8 }
  0x19   :  { %289 = shalt.err (!%p286_p10)
}
  0x1a   :  { %s290_s16 = scalar_lea.vmem %s35_s8, 256  ;;  %p295_p12 = scmp.lt.s32.totalorder %s35_s8, %s35_s8 }
  0x1b   :  { %p291_p11 = scmp.ne.s32.totalorder %s35_s8, %s290_s16  ;;  %p296_p13 = scmp.lt.s32.totalorder %s290_s16, %s290_s16 }
  0x1d   :  { %p297_p0 = por %p296_p13, %p295_p12 }
  0x1f   :  { %p298_p1 = pnand %p297_p0, %p291_p11 }
  0x21   :  { %301 = shalt.err (!%p298_p1)
}
  0x22   :  { %40 = dma.hbm_to_vmem [thread:$0]  %s428_s3, 256, %s35_s8, [#allocation6], %s331_s28, %s331_s28, %s332_s29  }
  0x23   :  { %324 = dma.done.wait [#allocation3], 256  }
  0x24   :  { %325 = vsyncadd [#allocation3], 4294967040 }
  0x25   :  { %326 = dma.done.wait [#allocation6], 256  }
  0x26   :  { %327 = vsyncadd [#allocation6], 4294967040  ;;  %v334_v0 = vmov 0.0   ;;  %vm335_vm0 = vmmov 0   ;;  %v336_v1 = vmov 0   ;;  %v254_v2 = vld [vmem:[#allocation5] sm:$0xff]  }
  0x27   :  { %227 = vmatprep.subr.bf16.mxu0 %v334_v0  ;;  %235 = vmatprep.subr.bf16.mxu1 %v334_v0  ;;  %v255_v3 = vld [vmem:[#allocation2] sm:$0xff]   ;;  %v256_v4 = vld [vmem:[#allocation5 + $0x8] sm:$0xff]   ;;  %v257_v5 = vld [vmem:[#allocation2 + $0x8] sm:$0xff]   ;;  %vm73_vm1 = vcmask 261120  }
  0x28   :  { %231 = vmatprep.mubr.msk.bf16.mxu0 %vm335_vm0, %v334_v0  ;;  %239 = vmatprep.mubr.msk.bf16.mxu1 %vm335_vm0, %v334_v0  ;;  %v50_v6 = vld [vmem:[%s425_s0] sm:$0xff]  ;;  %v51_v7 = vld [vmem:[%s425_s0 + $0x8] sm:$0xff] }
  0x29   :  { %253 = vset.pattern.permute.xlu0 %v336_v1  ;;  %228 = vmatpush3.bf16.msra.mxu0 %v254_v2  ;;  %v118_v8 = vld [vmem:[%s426_s1] sm:$0xff]  ;;  %v52_v9 = vpack.c.bf16 %v51_v7, %v50_v6  ;;  %v119_v10 = vld [vmem:[%s426_s1 + $0x8] sm:$0xff]  ;;  %s337_s1 = smov [#allocation7]  }
  0x2a   :  { %236 = vmatpush3.bf16.msra.mxu1 %v255_v3  ;;  %229 = vmatprep.subr.bf16.mxu0 %v334_v0  ;;  %v220_v17 = vld [vmem:[%s429_s4] ss:$0 sm:$0xff]  ;;  %s201_s26 = sshll.u32 %s337_s1, 4  ;;  %s202_s26 = int_to_ptr.vmem [resolvable:$true] %s201_s26 }
  0x2b   :  { %237 = vmatprep.subr.bf16.mxu1 %v334_v0  ;;  %122 = vperm.xlu0 %253, %v118_v8   ;;  %s302_s27 = scalar_lea.vmem %s202_s26, 256  ;;  %p307_p3 = scmp.lt.s32.totalorder %s202_s26, %s202_s26 }
  0x2c   :  { %p303_p2 = scmp.ne.s32.totalorder %s202_s26, %s302_s27  ;;  %p308_p4 = scmp.lt.s32.totalorder %s302_s27, %s302_s27 }
  0x2d   :  { %230 = vmatpush3.bf16.msra.mxu0 %v256_v4 }
  0x2e   :  { %238 = vmatpush3.bf16.msra.mxu1 %v257_v5  ;;  %p309_p5 = por %p308_p4, %p307_p3 }
  0x2f   :  { %127 = vperm.xlu0 %253, %v119_v10  }
  0x30   :  { %232 = vmatmul.mubr.msk.bf16.vlgmr.msra.gmra.mrb[0].mxu0 %vm73_vm1, %v52_v9  ;;  %p310_p6 = pnand %p309_p5, %p303_p2 }
  0x31   :  { %240 = vmatmul.mubr.msk.bf16.vlgmr.msra.gmra.mrb[0].mxu1 %vm73_vm1, %v52_v9 }
  0xaa   :  { %v123_v11 = vpop.permute.xlu0 %122 }
  0xae   :  { %v128_v12 = vpop.permute.xlu0 %127 }
 0x103   :  { %v111_v13 = vpop.f32.mrb[0].mxu0 }
 0x104   :  { %v130_v14 = vmul.f32 %v123_v11, %v111_v13  ;;  %v178_v15 = vpop.f32.mrb[0].mxu1  ;;  %v233_v16 = vpop.f32.mrb[1].mxu0 }
 0x105   :  { %v241_v18 = vpop.f32.mrb[1].mxu1  ;;  %v114_v19 = vpop.f32.mrb[2].mxu0 }
 0x106   :  { %v179_v20 = vadd.f32 %v178_v15, %v130_v14  ;;  %v131_v21 = vmul.f32 %v128_v12, %v114_v19  ;;  %v181_v22 = vpop.f32.mrb[2].mxu1  ;;  %v234_v23 = vpop.f32.mrb[3].mxu0 }
 0x107   :  { %v242_v24 = vpop.f32.mrb[3].mxu1 }
 0x108   :  { %v192_v25 = vadd.f32 %v220_v17, %v179_v20  ;;  %v182_v26 = vadd.f32 %v181_v22, %v131_v21 }
 0x10a   :  { %194 = vst.msk [vmem:[#allocation7] sm:$0xff] %vm73_vm1, %v192_v25  ;;  %v193_v27 = vadd.f32 %v220_v17, %v182_v26 }
 0x10c   :  { %195 = vst.msk [vmem:[#allocation7 + $0x8] sm:$0xff] %vm73_vm1, %v193_v27 }
 0x10d   :  { %313 = shalt.err (!%p310_p6)
}
 0x10e   :  { %s314_s29 = scalar_lea.hbm %s430_s5, 256 }
 0x10f   :  { %p315_p7 = scmp.ne.s32.totalorder %s430_s5, %s314_s29  ;;  %p318_p8 = scmp.lt.u32.totalorder %s314_s29, %s430_s5 }
 0x111   :  { %p320_p9 = pnand %p318_p8, %p315_p7 }
 0x113   :  { %323 = shalt.err (!%p320_p9)
}
 0x114   :  { %s338_s9 = smov 128   ;;  %s339_s10 = smov 8  }
 0x115   :  { %207 = dma.vmem_to_hbm [thread:$0]  %s202_s26, 256, %s430_s5, [#allocation4], %s338_s9, %s338_s9, %s339_s10  }
 0x116   :  { %328 = dma.done.wait [#allocation4], 256  }
 0x117   :  { %329 = vsyncadd [#allocation4], 4294967040 }
 0x118   :  { %211 = vsyncpa [#allocation3], 1 }
 0x119   :  { %212 = vsyncpa [#allocation6], 1 }
 0x11a   :  { %213 = vsyncpa [#allocation4], 1 }

</bundles_post_ra>
